<compile_context>
chip_gen: v5e
topology: v5e:2x2
jax: 0.10.0
libtpu: 0.0.40
codegen_flags: <defaults>
</compile_context>

<pallas_src>
import jax
import jax.numpy as jnp
from jax.experimental import pallas as pl
from jax.experimental.pallas import tpu as pltpu


def _round_up(x, m):
    return ((x + m - 1) // m) * m


def _patch_embed_kernel(p_ref, w_ref, shift_ref, o_ref):
    # (tile_m, K) bf16 @ (K, E) bf16 on the MXU, f32 accumulation.
    acc = jnp.dot(p_ref[...], w_ref[...], preferred_element_type=jnp.float32)
    # conv bias + BatchNorm (inference) pre-folded into a single shift term.
    o_ref[...] = (acc + shift_ref[...]).astype(o_ref.dtype)


def _pick_tile_and_vmem(M, K, E):
    """Derive row-tile and scoped-VMEM limit from the actual chip generation."""
    try:
        vmem_cap = pltpu.get_tpu_info().vmem_capacity_bytes
    except Exception:  # interpret mode / older runtimes
        vmem_cap = 128 * 1024 * 1024
    # v7x (64 MiB physical) -> 32 MiB scoped limit; v5e/v6e (128 MiB) -> 64 MiB.
    vmem_limit = int(min(vmem_cap // 2, 64 * 1024 * 1024))

    # Per-row streaming cost: double-buffered patches tile (bf16) in + output
    # tile (f32) out; folded weight + shift stay resident.
    bytes_per_row = 2 * (K * 2) + 2 * (E * 4)
    resident = K * E * 2 + E * 4
    budget = max(vmem_limit // 4 - resident, 8 * bytes_per_row)
    tile_m = min(2048, budget // bytes_per_row)      # big tiles; ~0.35us/step overhead
    if M > 8:
        # keep >= 2 grid steps so v7x's two TensorCores both get work
        tile_m = min(tile_m, _round_up(pl.cdiv(M, 2), 8))
    tile_m = max(8, _round_up(int(tile_m), 8))
    tile_m = min(tile_m, _round_up(M, 8))
    return tile_m, vmem_limit


def overlap_patch_embed(x, conv_w, conv_b, bn_gamma, bn_beta, bn_mean, bn_var,
                        *, stride=4, eps=1e-5, compute_dtype=jnp.bfloat16):
    B, C, H, W = x.shape
    E, Cw, kh, kw = conv_w.shape
    assert Cw == C
    ph, pw = kh // 2, kw // 2
    Ho = (H + 2 * ph - kh) // stride + 1
    Wo = (W + 2 * pw - kw) // stride + 1
    M = B * Ho * Wo
    K = C * kh * kw
    out_dtype = x.dtype

    # ---- glue: single pass NCHW f32 -> padded NHWC bf16, then kh*kw strided
    # tap slices concatenated with C innermost ((kh, kw, C) K-order).  No K/M
    # zero-padding passes. ----
    x_nhwc = jnp.transpose(x, (0, 2, 3, 1)).astype(compute_dtype)
    x_pad = jnp.pad(x_nhwc, ((0, 0), (ph, ph), (pw, pw), (0, 0)))
    taps = []
    for i in range(kh):
        for j in range(kw):
            taps.append(
                x_pad[:, i:i + stride * Ho:stride, j:j + stride * Wo:stride, :])
    patches = jnp.concatenate(taps, axis=-1).reshape(M, K)      # (M, K) bf16

    # ---- fold BN (running stats) + conv bias into weight / shift ----
    scale = bn_gamma / jnp.sqrt(bn_var + eps)                   # (E,)
    shift = conv_b * scale + bn_beta - bn_mean * scale          # (E,)
    w_mat = jnp.transpose(conv_w, (2, 3, 1, 0)).reshape(K, E)   # (kh,kw,C,E)->(K,E)
    w_mat = (w_mat * scale[None, :]).astype(compute_dtype)
    shift2 = shift.astype(jnp.float32).reshape(1, E)

    tile_m, vmem_limit = _pick_tile_and_vmem(M, K, E)
    grid = (pl.cdiv(M, tile_m),)

    out = pl.pallas_call(
        _patch_embed_kernel,
        out_shape=jax.ShapeDtypeStruct((M, E), out_dtype),
        grid_spec=pltpu.PrefetchScalarGridSpec(
            num_scalar_prefetch=0,
            grid=grid,
            in_specs=[
                # patches tile: real K as a full-dim last axis (no 128 pad)
                pl.BlockSpec((tile_m, K), lambda i: (i, 0)),
                # folded weight, resident across the whole grid
                pl.BlockSpec((K, E), lambda i: (0, 0)),
                # fused conv-bias + BN shift
                pl.BlockSpec((1, E), lambda i: (0, 0)),
            ],
            # unpadded E, written once in the final (B*N, E) layout
            out_specs=pl.BlockSpec((tile_m, E), lambda i: (i, 0)),
        ),
        compiler_params=pltpu.CompilerParams(
            dimension_semantics=("parallel",),
            vmem_limit_bytes=vmem_limit),
    )(patches, w_mat, shift2)

    # (M, E) -> (B, N, E): contiguous, free metadata reshape (no copy pass).
    return out.reshape(B, Ho * Wo, E), Ho, Wo


def _reference(x, conv_w, conv_b, gamma, beta, mean, var, *, stride=4, eps=1e-5):
    kh, kw = conv_w.shape[2], conv_w.shape[3]
    ph, pw = kh // 2, kw // 2
    y = jax.lax.conv_general_dilated(
        x, conv_w, window_strides=(stride, stride),
        padding=((ph, ph), (pw, pw)),
        dimension_numbers=("NCHW", "OIHW", "NCHW"))
    y = y + conv_b[None, :, None, None]
    y = (y - mean[None, :, None, None]) / jnp.sqrt(var[None, :, None, None] + eps)
    y = y * gamma[None, :, None, None] + beta[None, :, None, None]
    B, E, Ho, Wo = y.shape
    return y.reshape(B, E, Ho * Wo).transpose(0, 2, 1), Ho, Wo


if __name__ == "__main__":
    # small, deterministic example consistent with the module
    B, C, H, W = 2, 4, 16, 16
    E, KS, STRIDE = 32, 7, 4

    key = jax.random.PRNGKey(0)
    k_x, k_w, k_b, k_g, k_be, k_m, k_v = jax.random.split(key, 7)

    x = jax.random.normal(k_x, (B, C, H, W), dtype=jnp.float32)
    conv_w = jax.random.normal(k_w, (E, C, KS, KS), dtype=jnp.float32) * 0.05
    conv_b = jax.random.normal(k_b, (E,), dtype=jnp.float32) * 0.1
    bn_gamma = 1.0 + 0.1 * jax.random.normal(k_g, (E,), dtype=jnp.float32)
    bn_beta = 0.1 * jax.random.normal(k_be, (E,), dtype=jnp.float32)
    bn_mean = 0.1 * jax.random.normal(k_m, (E,), dtype=jnp.float32)
    bn_var = 0.5 + jnp.abs(jax.random.normal(k_v, (E,), dtype=jnp.float32))

    out, Ho, Wo = overlap_patch_embed(
        x, conv_w, conv_b, bn_gamma, bn_beta, bn_mean, bn_var, stride=STRIDE)
    out = jax.block_until_ready(out)

    ref, Ho_r, Wo_r = _reference(
        x, conv_w, conv_b, bn_gamma, bn_beta, bn_mean, bn_var, stride=STRIDE)
    assert (Ho, Wo) == (Ho_r, Wo_r)
    assert out.shape == (B, Ho * Wo, E)
    # bf16 MXU inputs -> slightly looser tolerance than pure f32
    assert jnp.allclose(out, ref, atol=5e-2, rtol=5e-2)

    print("KERNEL_OK")
</pallas_src>

<mosaic_0001>
module attributes {stable_mosaic.version = 11 : i64} {
  func.func @_patch_embed_kernel(%arg0: i32, %arg1: memref<16x196xbf16, #tpu.memory_space<vmem>>, %arg2: memref<196x32xbf16, #tpu.memory_space<vmem>>, %arg3: memref<1x32xf32, #tpu.memory_space<vmem>>, %arg4: memref<16x32xf32, #tpu.memory_space<vmem>>) attributes {dimension_semantics = [#tpu.dimension_semantics<parallel>], iteration_bounds = array<i64: 2>, scalar_prefetch = 0 : i64, scratch_operands = 0 : i64, tpu.core_type = #tpu.core_type<tc>, window_params = [{transform_indices = @transform_0, window_bounds = array<i64: 16, 196>}, {pipeline_mode = #tpu.pipeline_mode<synchronous>, transform_indices = @transform_1, window_bounds = array<i64: 196, 32>}, {pipeline_mode = #tpu.pipeline_mode<synchronous>, transform_indices = @transform_2, window_bounds = array<i64: 1, 32>}, {transform_indices = @transform_3, window_bounds = array<i64: 16, 32>}]} {
    %c0 = arith.constant 0 : index
    %c0_0 = arith.constant 0 : index
    %0 = vector.load %arg1[%c0, %c0_0] : memref<16x196xbf16, #tpu.memory_space<vmem>>, vector<16x196xbf16>
    %c0_1 = arith.constant 0 : index
    %c0_2 = arith.constant 0 : index
    %1 = vector.load %arg2[%c0_1, %c0_2] : memref<196x32xbf16, #tpu.memory_space<vmem>>, vector<196x32xbf16>
    %cst = arith.constant dense<0.000000e+00> : vector<16x32xf32>
    %2 = tpu.matmul %0, %1, %cst {dimension_numbers = #tpu.dot_dimension_numbers<[1], [0], [0], [1], [0, 0, 1, 1], [], []>} : vector<16x196xbf16>, vector<196x32xbf16>, vector<16x32xf32> -> vector<16x32xf32>
    %c0_3 = arith.constant 0 : index
    %c0_4 = arith.constant 0 : index
    %3 = vector.load %arg3[%c0_3, %c0_4] : memref<1x32xf32, #tpu.memory_space<vmem>>, vector<1x32xf32>
    %4 = vector.broadcast %3 : vector<1x32xf32> to vector<16x32xf32>
    %5 = arith.addf %2, %4 : vector<16x32xf32>
    %c0_5 = arith.constant 0 : index
    %c0_6 = arith.constant 0 : index
    %6 = vector.load %arg4[%c0_5, %c0_6] : memref<16x32xf32, #tpu.memory_space<vmem>>, vector<16x32xf32>
    tpu.vector_store %arg4[%c0_5, %c0_6], %5 {strides = array<i32>} : memref<16x32xf32, #tpu.memory_space<vmem>>, vector<16x32xf32>,
    return
  }
  func.func @transform_0(%arg0: i32) -> (i32, i32) {
    %c0_i32 = arith.constant 0 : i32
    %c0_i32_0 = arith.constant 0 : i32
    return %arg0, %c0_i32 : i32, i32
  }
  func.func @transform_1(%arg0: i32) -> (i32, i32) {
    %c0_i32 = arith.constant 0 : i32
    %c0_i32_0 = arith.constant 0 : i32
    %c0_i32_1 = arith.constant 0 : i32
    return %c0_i32, %c0_i32_0 : i32, i32
  }
  func.func @transform_2(%arg0: i32) -> (i32, i32) {
    %c0_i32 = arith.constant 0 : i32
    %c0_i32_0 = arith.constant 0 : i32
    %c0_i32_1 = arith.constant 0 : i32
    return %c0_i32, %c0_i32_0 : i32, i32
  }
  func.func @transform_3(%arg0: i32) -> (i32, i32) {
    %c0_i32 = arith.constant 0 : i32
    %c0_i32_0 = arith.constant 0 : i32
    return %arg0, %c0_i32 : i32, i32
  }
}

</mosaic_0001>

<bundles_post_ra>
// kernel: tpu_custom_call.1
= control target key start
LH: loop header
LB: loop body
LE: loop exit
PB: predicated region body
PF: predicated region fallthrough
CT: control target
= control target key end

     0   :  { %8 = vsyncpa [#allocation3], 0  ;;  %s748_s0 = inlined_call_operand.vmem [shape: bf16[32,196], index: 0, kind: input, shape index: {}]   ;;  %s749_s1 = inlined_call_operand.vmem [shape: bf16[196,32], index: 1, kind: input, shape index: {}]   ;;  %s750_s2 = inlined_call_operand.vmem [shape: f32[1,32], index: 2, kind: input, shape index: {}]   ;;  %s751_s3 = inlined_call_operand.hbm [shape: f32[32,32], index: 3, kind: output, shape index: {}]  }
   0x1   :  { %10 = vsyncpa [#allocation3 + $0x1], 0  ;;  %s622_s12 = smov 0   ;;  %s624_s13 = smov 0  }
   0x2   :  { %s626_s14 = smov 0   ;;  %s628_s15 = smov 0  }
   0x3 LB: > { %s643_s16 = sadd.s32 4294967295, %s598_s15   ;;  %s408_s17 = sadd.s32 4294967294, %s598_s15   ;;  %s598_s15 = sphi %s628_s15, %s757_s15   ;;  %s594_s14 = sphi %s626_s14, %s756_s14   ;;  %s590_s13 = sphi %s624_s13, %s755_s13   ;;  %s586_s12 = sphi %s622_s12, %s754_s12  }
   0x4   : > { %s647_s18 = sadd.s32 1, %s598_s15   ;;  %s91_s19 = sadd.s32 1, %s594_s14 }
   0x5   : > { %s88_s20 = ssub.s32 %s598_s15, %s647_s18  ;;  %p101_p0 = scmp.ne.s32.totalorder %s594_s14, %s590_s13 }
   0x6   : > { %p89_p1 = scmp.eq.s32.totalorder %s88_s20, 0  ;;  %p102_p2 = scmp.eq.s32.totalorder %s643_s16, 1 }
   0x7   : > { %p107_p3 = scmp.ne.s32.totalorder %s590_s13, %s586_s12  ;;  %p108_p4 = scmp.eq.s32.totalorder %s408_s17, 1 }
   0x8   : > { %s658_s21 = scalar_select %p89_p1, %s594_s14, %s91_s19  }
   0x9   : > { %p660_p5 = por %p102_p2, %p101_p0  ;;  %p664_p6 = por %p108_p4, %p107_p3 }
   0xa   : > { %p411_p7 = scmp.ge.s32.totalorder %s598_s15, 1  ;;  %p142_p8 = scmp.lt.s32.totalorder %s598_s15, 3 }
   0xc   : > { %p143_p9 = pnand %p411_p7, %p142_p8 }
   0xd   : > { %s413_s28 = sshll.u32 (!%p143_p9), %s643_s16, 1  ;;  %s164_s10 = sand.u32 (!%p143_p9), 1, %s590_s13  }
   0xe   : > { %146 = sbr.rel (%p143_p9) target bundleno = 193 (0xc1), region = 32  ;;  %p168_p10 = scmp.lt.s32.totalorder (!%p143_p9), %s413_s28, 3 }
   0xf   : > { %s412_s19 = sshll.u32 (!%p143_p9), %s164_s10, 4  ;;  %s493_s20 = sshll.u32 (!%p143_p9), %s643_s16, 4 }
  0x10   : > { %s342_s26 = scalar_lea.hbm (!%p143_p9), %s751_s3, %s493_s20  ;;  %s166_s27 = scalar_lea.vmem (!%p143_p9), [#allocation2], %s412_s19 }
  0x11   : > { %s345_s30 = sshll.u32 (!%p143_p9), %s342_s26, 4  ;;  %s331_s4 = scalar_lea.sflag (!%p143_p9), [#allocation3], %s164_s10  ;;  %s346_s30 = int_to_ptr.hbm [resolvable:$true] %s345_s30 }
  0x12   : > { %s550_s16 = sshra.s32 (!%p143_p9), %s346_s30, 4  ;;  %s556_s7 = scalar_lea.hbm (!%p143_p9), %s751_s3, 32  ;;  %s551_s16 = int_to_ptr.hbm [resolvable:$true] %s550_s16 }
  0x13   : > { %v488_v0 = vld [vmem:[%s749_s1 + $0x38] sm:$0xff]  ;;  %v202_v1 = vld [vmem:[%s749_s1 + $0x60] sm:$0x3]  ;;  %v487_v3 = vld [vmem:[%s749_s1 + $0x30] sm:$0xff]  ;;  %vm295_vm0 = vcmask 1041408   ;;  %s759_s28 = smov (!%p168_p10, %s413_s28), 3  ;;  %p557_p0 = scmp.lt.s32.totalorder %s551_s16, %s751_s3 }
  0x14   : > { %v265_v2 = vunpack.c.l.b16 %v202_v1  ;;  %299 = vmatpush.bf16.msra.mxu0 %v488_v0  ;;  %v486_v6 = vld [vmem:[%s749_s1 + $0x28] sm:$0xff]  ;;  %v492_v7 = vld [vmem:[%s749_s1 + $0x58] sm:$0xff]  ;;  %v485_v8 = vld [vmem:[%s749_s1 + $0x20] sm:$0xff]  ;;  %s478_s17 = sshll.u32 %s759_s28, 3  ;;  %vm291_vm1 = vcmask 556032   ;;  %vm327_vm2 = vcmask 261120  }
  0x15   : > { %v491_v9 = vld [vmem:[%s749_s1 + $0x50] sm:$0xff]  ;;  %v484_v10 = vld [vmem:[%s749_s1 + $0x18] sm:$0xff]  ;;  %v490_v11 = vld [vmem:[%s749_s1 + $0x48] sm:$0xff]  ;;  %s172_s29 = scalar_lea.vmem %s748_s0, %s478_s17  ;;  %s552_s28 = scalar_lea.hbm %s551_s16, 16 }
  0x16   : > { %v278_v4 = vpack.c.b16 %v265_v2, %v265_v2  ;;  %v483_v12 = vld [vmem:[%s749_s1 + $0x10] sm:$0xff]  ;;  %v489_v13 = vld [vmem:[%s749_s1 + $0x40] sm:$0xff]  ;;  %v420_v15 = vld [vmem:[%s172_s29 + $0x8] sm:$0xf0]  ;;  %p553_p11 = scmp.ne.s32.totalorder %s551_s16, %s552_s28  ;;  %p558_p1 = scmp.lt.s32.totalorder %s556_s7, %s552_s28 }
  0x17   : > { %v479_v14 = vld [vmem:[%s172_s29 + $0x4] sm:$0xf]  ;;  %v482_v17 = vld [vmem:[%s749_s1 + $0x8] sm:$0xff]  ;;  %v418_v19 = vld [vmem:[%s172_s29] sm:$0xf] }
  0x18   : > { %v297_v5 = vsel %vm295_vm0, %v278_v4, 0  ;;  %300 = vmatpush.bf16.msra.mxu0 %v487_v3  ;;  %v423_v16 = vor.u32 %v479_v14, %v420_v15  ;;  %v481_v18 = vld [vmem:[%s749_s1] sm:$0xff]  ;;  %v480_v20 = vld [vmem:[%s172_s29 + $0x4] sm:$0xf0]  ;;  %s343_s29 = sshll.u32 %s166_s27, 4  ;;  %p554_p12 = pnand %p553_p11, %p660_p5  ;;  %s344_s29 = int_to_ptr.vmem [resolvable:$true] %s343_s29 }
  0x19   : > { %316 = vmatpush.bf16.msra.mxu1 %v297_v5  ;;  %v419_v21 = vor.u32 %v480_v20, %v418_v19  ;;  %v535_v22 = vld [vmem:[%s750_s2] ss:$0 sm:$0xff]  ;;  %p559_p2 = por %p558_p1, %p557_p0 }
  0x1a   : > { %p555_p13 = pneg %p554_p12 }
  0x1c   : > { %301 = vmatpush.bf16.msra.mxu0 %v486_v6  ;;  %p560_p3 = pnand %p559_p2, %p555_p13 }
  0x1d   : > { %317 = vmatpush.bf16.msra.mxu1 %v492_v7 }
  0x20   : > { %302 = vmatpush.bf16.msra.mxu0 %v485_v8 }
  0x21   : > { %318 = vmatpush.bf16.msra.mxu1 %v491_v9 }
  0x24   : > { %303 = vmatpush.bf16.msra.mxu0 %v484_v10 }
  0x25   : > { %319 = vmatpush.bf16.msra.mxu1 %v490_v11 }
  0x28   : > { %304 = vmatpush.bf16.msra.mxu0 %v483_v12 }
  0x29   : > { %320 = vmatpush.bf16.msra.mxu1 %v489_v13 }
  0x2c   : > { %472 = vmatmul.msk.bf16.vlgmr.msra.gmra.mxu1 %vm291_vm1, %v423_v16  ;;  %305 = vmatpush.bf16.msra.mxu0 %v482_v17 }
  0x30   : > { %306 = vmatpush.bf16.msra.mxu0 %v481_v18 }
  0x33   : > { %307 = vmatmul.bf16.vlgmr.msra.gmra.mxu0 %v419_v21 }
  0xa9   : > { %v322_v23 = vpop.f32.mrf.mxu1 }
  0xb0   : > { %v308_v24 = vpop.f32.mrf.mxu0 }
  0xb1   : > { %v309_v25 = vadd.f32 %v535_v22, %v308_v24  ;;  %v324_v29 = vpop.f32.mrf.mxu1 }
  0xb3   : > { %v323_v26 = vadd.f32 %v322_v23, %v309_v25 }
  0xb5   : > { %328 = vst.msk [vmem:[%s166_s27] sm:$0xff] %vm327_vm2, %v323_v26 }
  0xb8   : > { %v310_v27 = vpop.f32.mrf.mxu0 }
  0xb9   : > { %v311_v28 = vadd.f32 %v535_v22, %v310_v27 }
  0xbb   : > { %v325_v30 = vadd.f32 %v324_v29, %v311_v28 }
  0xbd   : > { %329 = vst.msk [vmem:[%s166_s27 + $0x8] sm:$0xff] %vm327_vm2, %v325_v30 }
  0xbe   : > { %563 = shalt.err (!%p560_p3)
}
  0xbf   : > { %s600_s10 = smov 128   ;;  %s601_s11 = smov 8  }
  0xc0   : > { %494 = dma.vmem_to_hbm [thread:$0]  (%p660_p5), %s344_s29, 256, %s346_s30, %s331_s4, %s600_s10, %s600_s10, %s601_s11  }
  0xc1 PF: > { %p500_p4 = scmp.ge.s32.totalorder %s598_s15, 2  ;;  %s360_s17 = sand.u32 1, %s586_s12  }
  0xc2   : > { %s361_s19 = scalar_lea.sflag [#allocation3], %s360_s17 }
  0xc3   : > { %p497_p7 = pnand %p500_p4, %p664_p6 }
  0xc5   : > { %p498_p8 = pneg %p497_p7 }
  0xc7   : > { %581 = dma.done.wait (%p498_p8), %s361_s19, 256  }
  0xc8   : > { %583 = vsyncadd (%p498_p8), %s361_s19, 4294967040  ;;  %p13_p9 = scmp.ge.s32.totalorder %s647_s18, 4   ;;  %s754_s12 = smov %s590_s13 }
  0xc9   : > { %s755_s13 = smov %s594_s14  ;;  %s756_s14 = smov %s658_s21 }
  0xca   : > { %s757_s15 = smov %s647_s18  ;;  %15 = sbr.rel (!%p13_p9) target bundleno = 3 (0x3), region = 67 }
  0xcf   :  { %367 = vsyncpa [#allocation3], 1 }
  0xd0   :  { %369 = vsyncpa [#allocation3 + $0x1], 1 }

</bundles_post_ra>
